<compile_context>
chip_gen: v6e
topology: v6e:2x2x1
jax: 0.10.0
libtpu: 0.0.40
codegen_flags: <defaults>
</compile_context>

<pallas_src>
import functools

import jax
import jax.numpy as jnp
from jax import lax
from jax.experimental import pallas as pl
from jax.experimental.pallas import tpu as pltpu


# -----------------------------------------------------------------------------
# Pallas kernel: one batch tile of  tanh(x @ W^T + b)
# -----------------------------------------------------------------------------
def _linear_tanh_kernel(x_ref, w_ref, b_ref, o_ref):
    x = x_ref[...]                       # (TB, H)   activation tile
    w = w_ref[...]                       # (H, H)    nn.Linear weight, (out, in) layout
    # x @ W^T without materializing a transpose: contract x dim 1 with w dim 1 ("in").
    y = lax.dot_general(
        x, w,
        dimension_numbers=(((1,), (1,)), ((), ())),
        preferred_element_type=jnp.float32,
    )
    y = y + b_ref[...].astype(jnp.float32)          # f32 bias-add
    o_ref[...] = jnp.tanh(y).astype(o_ref.dtype)    # f32 tanh epilogue (VPU/EUP)


# -----------------------------------------------------------------------------
# Wrapper: padding, tiling, pallas_call
# -----------------------------------------------------------------------------
def _round_up(n, m):
    return ((n + m - 1) // m) * m


def linear_tanh(x, weight, bias, *, block_b=256, compute_dtype=None):
    """tanh(x @ weight^T + bias) for x:(B,H), weight:(H,H) in torch (out,in) layout."""
    B, H = x.shape
    out_dtype = x.dtype

    # Pad features to a lane multiple (128) and batch to a sublane multiple (8).
    H_pad = _round_up(H, 128)
    B8 = _round_up(B, 8)
    TB = max(8, min(_round_up(block_b, 8), B8))
    B_pad = _round_up(B8, TB)

    if compute_dtype is None:
        compute_dtype = x.dtype

    xp = x.astype(compute_dtype)
    if (B_pad, H_pad) != (B, H):
        xp = jnp.pad(xp, ((0, B_pad - B), (0, H_pad - H)))
    wp = weight.astype(compute_dtype)
    if H_pad != H:
        wp = jnp.pad(wp, ((0, H_pad - H), (0, H_pad - H)))
    bp = bias.reshape(1, H).astype(jnp.float32)
    if H_pad != H:
        bp = jnp.pad(bp, ((0, 0), (0, H_pad - H)))

    grid = (B_pad // TB,)
    bytes_per = jnp.dtype(compute_dtype).itemsize
    cost = pl.CostEstimate(
        flops=2 * B_pad * H_pad * H_pad,
        transcendentals=B_pad * H_pad,
        bytes_accessed=(B_pad * H_pad * bytes_per          # activations in
                        + H_pad * H_pad * bytes_per        # weight
                        + H_pad * 4                        # bias
                        + B_pad * H_pad * jnp.dtype(out_dtype).itemsize),  # out
    )

    out = pl.pallas_call(
        _linear_tanh_kernel,
        out_shape=jax.ShapeDtypeStruct((B_pad, H_pad), out_dtype),
        grid=grid,
        in_specs=[
            pl.BlockSpec((TB, H_pad), lambda i: (i, 0)),     # activation tile
            pl.BlockSpec((H_pad, H_pad), lambda i: (0, 0)),  # weight: resident
            pl.BlockSpec((1, H_pad), lambda i: (0, 0)),      # bias: resident
        ],
        out_specs=pl.BlockSpec((TB, H_pad), lambda i: (i, 0)),
        compiler_params=pltpu.CompilerParams(
            dimension_semantics=("parallel",),
        ),
        cost_estimate=cost,
    )(xp, wp, bp)

    if (B_pad, H_pad) != (B, H):
        out = out[:B, :H]
    return out


# -----------------------------------------------------------------------------
# ClassifierCodeT5 forward
# -----------------------------------------------------------------------------
def encoder_stub(input_ids, attention_mask, emb_table):
    # TODO(synk): the CodeT5 encoder is an external pretrained transformer with no
    # in-script weights; a deterministic token-embedding stub produces last_hidden_state.
    h = emb_table[input_ids]                                  # (B, S, H)
    if attention_mask is not None:
        h = h * attention_mask[..., None].astype(h.dtype)
    return h


def classifier_codet5_forward(params, input_ids=None, attention_mask=None,
                              smart=False, target=None, compute_dtype=None):
    """Mirrors ClassifierCodeT5.forward. Dropout is defined in __init__ but never used
    in the reference forward, so it is (correctly) absent here."""
    if smart:
        return linear_tanh(target, params["w"], params["b"],
                           compute_dtype=compute_dtype)
    last_hidden_state = encoder_stub(input_ids, attention_mask, params["emb"])
    raw_emb = last_hidden_state[:, 0, :]          # CLS slice in the wrapper (no kernel DMA of S)
    x = linear_tanh(raw_emb, params["w"], params["b"], compute_dtype=compute_dtype)
    return x, raw_emb


# -----------------------------------------------------------------------------
# Main
# -----------------------------------------------------------------------------
if __name__ == "__main__":
    B, S, H, V = 2, 8, 32, 100

    key = jax.random.PRNGKey(0)
    k_emb, k_w, k_b, k_ids, k_tgt = jax.random.split(key, 5)

    params = {
        "emb": jax.random.normal(k_emb, (V, H), dtype=jnp.float32) * 0.1,
        # nn.Linear(hidden, hidden): weight (out, in), bias (out,)
        "w": jax.random.normal(k_w, (H, H), dtype=jnp.float32) * 0.1,
        "b": jax.random.normal(k_b, (H,), dtype=jnp.float32) * 0.1,
    }

    input_ids = jax.random.randint(k_ids, (B, S), 0, V, dtype=jnp.int32)
    attention_mask = jnp.ones((B, S), dtype=jnp.int32)

    # ---------------- Non-smart path (f32) ----------------
    x, raw_emb = classifier_codet5_forward(params, input_ids=input_ids,
                                           attention_mask=attention_mask)
    x = jax.block_until_ready(x)
    raw_emb = jax.block_until_ready(raw_emb)

    h_ref = encoder_stub(input_ids, attention_mask, params["emb"])
    raw_ref = h_ref[:, 0, :]
    x_ref = jnp.tanh(raw_ref @ params["w"].T + params["b"])
    assert jnp.allclose(x, x_ref, atol=1e-5), "non-smart path mismatch"
    assert jnp.allclose(raw_emb, raw_ref, atol=1e-6), "raw_emb mismatch"

    # ---------------- Smart path (f32) ----------------
    target = jax.random.normal(k_tgt, (B, H), dtype=jnp.float32)
    x_smart = jax.block_until_ready(
        classifier_codet5_forward(params, smart=True, target=target))
    x_smart_ref = jnp.tanh(target @ params["w"].T + params["b"])
    assert jnp.allclose(x_smart, x_smart_ref, atol=1e-5), "smart path mismatch"

    # ---------------- Smart path with bf16 MXU inputs (f32 accumulate/epilogue) ----------------
    x_bf16 = jax.block_until_ready(
        classifier_codet5_forward(params, smart=True, target=target,
                                  compute_dtype=jnp.bfloat16))
    assert jnp.allclose(x_bf16, x_smart_ref, atol=2e-2, rtol=2e-2), "bf16 path mismatch"

    print("KERNEL_OK")
</pallas_src>

<mosaic_0001>
module attributes {stable_mosaic.version = 11 : i64} {
  func.func @_linear_tanh_kernel(%arg0: i32, %arg1: memref<8x128xf32, #tpu.memory_space<vmem>>, %arg2: memref<128x128xf32, #tpu.memory_space<vmem>>, %arg3: memref<1x128xf32, #tpu.memory_space<vmem>>, %arg4: memref<8x128xf32, #tpu.memory_space<vmem>>) attributes {dimension_semantics = [#tpu.dimension_semantics<parallel>], iteration_bounds = array<i64: 1>, scalar_prefetch = 0 : i64, scratch_operands = 0 : i64, tpu.core_type = #tpu.core_type<tc>, window_params = [{transform_indices = @transform_0, window_bounds = array<i64: 8, 128>}, {pipeline_mode = #tpu.pipeline_mode<synchronous>, transform_indices = @transform_1, window_bounds = array<i64: 128, 128>}, {pipeline_mode = #tpu.pipeline_mode<synchronous>, transform_indices = @transform_2, window_bounds = array<i64: 1, 128>}, {transform_indices = @transform_3, window_bounds = array<i64: 8, 128>}]} {
    %c0 = arith.constant 0 : index
    %c0_0 = arith.constant 0 : index
    %0 = vector.load %arg1[%c0, %c0_0] : memref<8x128xf32, #tpu.memory_space<vmem>>, vector<8x128xf32>
    %c0_1 = arith.constant 0 : index
    %c0_2 = arith.constant 0 : index
    %1 = vector.load %arg2[%c0_1, %c0_2] : memref<128x128xf32, #tpu.memory_space<vmem>>, vector<128x128xf32>
    %cst = arith.constant dense<0.000000e+00> : vector<8x128xf32>
    %2 = tpu.matmul %0, %1, %cst {dimension_numbers = #tpu.dot_dimension_numbers<[1], [1], [0], [0], [0, 0, 1, 0], [], []>} : vector<8x128xf32>, vector<128x128xf32>, vector<8x128xf32> -> vector<8x128xf32>
    %c0_3 = arith.constant 0 : index
    %c0_4 = arith.constant 0 : index
    %3 = vector.load %arg3[%c0_3, %c0_4] : memref<1x128xf32, #tpu.memory_space<vmem>>, vector<1x128xf32>
    %4 = vector.broadcast %3 : vector<1x128xf32> to vector<8x128xf32>
    %5 = arith.addf %2, %4 : vector<8x128xf32>
    %6 = math.tanh %5 : vector<8x128xf32>
    %c0_5 = arith.constant 0 : index
    %c0_6 = arith.constant 0 : index
    %7 = vector.load %arg4[%c0_5, %c0_6] : memref<8x128xf32, #tpu.memory_space<vmem>>, vector<8x128xf32>
    tpu.vector_store %arg4[%c0_5, %c0_6], %6 {strides = array<i32>} : memref<8x128xf32, #tpu.memory_space<vmem>>, vector<8x128xf32>,
    return
  }
  func.func @transform_0(%arg0: i32) -> (i32, i32) {
    %c0_i32 = arith.constant 0 : i32
    %c0_i32_0 = arith.constant 0 : i32
    return %arg0, %c0_i32 : i32, i32
  }
  func.func @transform_1(%arg0: i32) -> (i32, i32) {
    %c0_i32 = arith.constant 0 : i32
    %c0_i32_0 = arith.constant 0 : i32
    %c0_i32_1 = arith.constant 0 : i32
    return %c0_i32, %c0_i32_0 : i32, i32
  }
  func.func @transform_2(%arg0: i32) -> (i32, i32) {
    %c0_i32 = arith.constant 0 : i32
    %c0_i32_0 = arith.constant 0 : i32
    %c0_i32_1 = arith.constant 0 : i32
    return %c0_i32, %c0_i32_0 : i32, i32
  }
  func.func @transform_3(%arg0: i32) -> (i32, i32) {
    %c0_i32 = arith.constant 0 : i32
    %c0_i32_0 = arith.constant 0 : i32
    return %arg0, %c0_i32 : i32, i32
  }
}

</mosaic_0001>

<bundles_post_ra>
// kernel: tpu_custom_call.1
= control target key start
LH: loop header
LB: loop body
LE: loop exit
PB: predicated region body
PF: predicated region fallthrough
CT: control target
= control target key end

     0   :  { %8 = vsyncpa [#allocation3], 0  ;;  %s320_s0 = inlined_call_operand.hbm [shape: f32[8,128], index: 0, kind: input, shape index: {}]   ;;  %s321_s1 = inlined_call_operand.hbm [shape: f32[128,128], index: 1, kind: input, shape index: {}]   ;;  %s322_s2 = inlined_call_operand.vmem [shape: f32[1,128], index: 2, kind: input, shape index: {}]   ;;  %s323_s3 = inlined_call_operand.hbm [shape: f32[8,128], index: 3, kind: output, shape index: {}]  }
   0x1   :  { %9 = vsyncpa [#allocation6], 0 }
   0x2   :  { %10 = vsyncpa [#allocation4], 0  ;;  %s281_s12 = smov [#allocation2]   ;;  %s282_s14 = smov [#allocation5]  }
   0x3   :  { %s17_s13 = sshll.u32 %s281_s12, 4  ;;  %s26_s15 = sshll.u32 %s282_s14, 4  ;;  %s18_s13 = int_to_ptr.vmem [resolvable:$true] %s17_s13  ;;  %s27_s15 = int_to_ptr.vmem [resolvable:$true] %s26_s15 }
   0x4   :  { %s223_s16 = scalar_lea.vmem %s18_s13, 128  ;;  %p228_p1 = scmp.lt.s32.totalorder %s18_s13, %s18_s13 }
   0x5   :  { %p224_p0 = scmp.ne.s32.totalorder %s18_s13, %s223_s16  ;;  %p229_p2 = scmp.lt.s32.totalorder %s223_s16, %s223_s16 }
   0x7   :  { %p230_p3 = por %p229_p2, %p228_p1 }
   0x9   :  { %p231_p4 = pnand %p230_p3, %p224_p0 }
   0xb   :  { %234 = shalt.err (!%p231_p4)
}
   0xc   :  { %20 = dma.hbm_to_vmem [thread:$0]  %s320_s0, 128, %s18_s13, [#allocation3]  }
   0xd   :  { %s243_s19 = scalar_lea.vmem %s27_s15, 2048  ;;  %p248_p6 = scmp.lt.s32.totalorder %s27_s15, %s27_s15 }
   0xe   :  { %p244_p5 = scmp.ne.s32.totalorder %s27_s15, %s243_s19  ;;  %p249_p7 = scmp.lt.s32.totalorder %s243_s19, %s243_s19 }
  0x10   :  { %p250_p8 = por %p249_p7, %p248_p6 }
  0x12   :  { %p251_p9 = pnand %p250_p8, %p244_p5 }
  0x14   :  { %254 = shalt.err (!%p251_p9)
}
  0x15   :  { %s283_s20 = smov 128   ;;  %s284_s21 = smov 8  }
  0x16   :  { %32 = dma.hbm_to_vmem [thread:$0]  %s321_s1, 2048, %s27_s15, [#allocation6], %s283_s20, %s283_s20, %s284_s21  }
  0x17   :  { %275 = dma.done.wait [#allocation3], 128  }
  0x18   :  { %276 = vsyncadd [#allocation3], 4294967168 }
  0x19   :  { %277 = dma.done.wait [#allocation6], 2048  }
  0x1a   :  { %278 = vsyncadd [#allocation6], 4294965248  ;;  %v285_v0 = vmov 0.0   ;;  %vm286_vm0 = vmmov 0   ;;  %v57_v1 = vld [vmem:[#allocation5 + $0x78] sm:$0xff]  ;;  %v56_v2 = vld [vmem:[#allocation5 + $0x70] sm:$0xff] }
  0x1b   :  { %171 = vmatprep.subr.mxu0 %v285_v0  ;;  %203 = vmatprep.mubr.msk.f32.mxu0 %vm286_vm0, %v285_v0  ;;  %v55_v3 = vld [vmem:[#allocation5 + $0x68] sm:$0xff]  ;;  %v54_v4 = vld [vmem:[#allocation5 + $0x60] sm:$0xff]  ;;  %v53_v5 = vld [vmem:[#allocation5 + $0x58] sm:$0xff]  ;;  %s287_s24 = smov [#allocation7]  }
  0x1c   :  { %172 = vmatpush3.xpose.msra.mxu0 %v57_v1  ;;  %v52_v6 = vld [vmem:[#allocation5 + $0x50] sm:$0xff]  ;;  %v51_v7 = vld [vmem:[#allocation5 + $0x48] sm:$0xff]  ;;  %v50_v8 = vld [vmem:[#allocation5 + $0x40] sm:$0xff]  ;;  %s143_s25 = sshll.u32 %s287_s24, 4  ;;  %s144_s25 = int_to_ptr.vmem [resolvable:$true] %s143_s25 }
  0x1d   :  { %173 = vmatprep.subr.mxu0 %v285_v0  ;;  %v49_v9 = vld [vmem:[#allocation5 + $0x38] sm:$0xff]  ;;  %v48_v10 = vld [vmem:[#allocation5 + $0x30] sm:$0xff]  ;;  %v47_v11 = vld [vmem:[#allocation5 + $0x28] sm:$0xff]  ;;  %s255_s26 = scalar_lea.vmem %s144_s25, 128  ;;  %p260_p11 = scmp.lt.s32.totalorder %s144_s25, %s144_s25 }
  0x1e   :  { %v46_v12 = vld [vmem:[#allocation5 + $0x20] sm:$0xff]  ;;  %v45_v13 = vld [vmem:[#allocation5 + $0x18] sm:$0xff]  ;;  %v44_v14 = vld [vmem:[#allocation5 + $0x10] sm:$0xff]  ;;  %p256_p10 = scmp.ne.s32.totalorder %s144_s25, %s255_s26  ;;  %p261_p12 = scmp.lt.s32.totalorder %s255_s26, %s255_s26 }
  0x1f   :  { %v43_v15 = vld [vmem:[#allocation5 + $0x8] sm:$0xff]  ;;  %v42_v16 = vld [vmem:[#allocation5] sm:$0xff]  ;;  %v41_v17 = vld [vmem:[#allocation2] sm:$0xff] }
  0x20   :  { %174 = vmatpush3.xpose.msra.mxu0 %v56_v2  ;;  %v153_v18 = vld [vmem:[%s322_s2] ss:$0 sm:$0xff]  ;;  %p262_p13 = por %p261_p12, %p260_p11 }
  0x21   :  { %175 = vmatprep.subr.mxu0 %v285_v0 }
  0x22   :  { %p263_p0 = pnand %p262_p13, %p256_p10 }
  0x24   :  { %176 = vmatpush3.xpose.msra.mxu0 %v55_v3 }
  0x25   :  { %177 = vmatprep.subr.mxu0 %v285_v0 }
  0x28   :  { %178 = vmatpush3.xpose.msra.mxu0 %v54_v4 }
  0x29   :  { %179 = vmatprep.subr.mxu0 %v285_v0 }
  0x2c   :  { %180 = vmatpush3.xpose.msra.mxu0 %v53_v5 }
  0x2d   :  { %181 = vmatprep.subr.mxu0 %v285_v0 }
  0x30   :  { %182 = vmatpush3.xpose.msra.mxu0 %v52_v6 }
  0x31   :  { %183 = vmatprep.subr.mxu0 %v285_v0 }
  0x34   :  { %184 = vmatpush3.xpose.msra.mxu0 %v51_v7 }
  0x35   :  { %185 = vmatprep.subr.mxu0 %v285_v0 }
  0x38   :  { %186 = vmatpush3.xpose.msra.mxu0 %v50_v8 }
  0x39   :  { %187 = vmatprep.subr.mxu0 %v285_v0 }
  0x3c   :  { %188 = vmatpush3.xpose.msra.mxu0 %v49_v9 }
  0x3d   :  { %189 = vmatprep.subr.mxu0 %v285_v0 }
  0x40   :  { %190 = vmatpush3.xpose.msra.mxu0 %v48_v10 }
  0x41   :  { %191 = vmatprep.subr.mxu0 %v285_v0 }
  0x44   :  { %192 = vmatpush3.xpose.msra.mxu0 %v47_v11 }
  0x45   :  { %193 = vmatprep.subr.mxu0 %v285_v0 }
  0x48   :  { %194 = vmatpush3.xpose.msra.mxu0 %v46_v12 }
  0x49   :  { %195 = vmatprep.subr.mxu0 %v285_v0 }
  0x4c   :  { %196 = vmatpush3.xpose.msra.mxu0 %v45_v13 }
  0x4d   :  { %197 = vmatprep.subr.mxu0 %v285_v0 }
  0x50   :  { %198 = vmatpush3.xpose.msra.mxu0 %v44_v14 }
  0x51   :  { %199 = vmatprep.subr.mxu0 %v285_v0 }
  0x54   :  { %200 = vmatpush3.xpose.msra.mxu0 %v43_v15 }
  0x55   :  { %201 = vmatprep.subr.mxu0 %v285_v0 }
  0x58   :  { %202 = vmatpush3.xpose.msra.mxu0 %v42_v16 }
  0x5b   :  { %204 = vmatmul.mubr.f32.vlgmr.msra.gmra.mxu0 %v41_v17 }
 0x11b   :  { %v131_v19 = vpop.f32.mrf.mxu0 }
 0x11c   :  { %v132_v20 = vadd.f32 %v153_v18, %v131_v19 }
 0x11d   :  { %v205_v21 = vpop.f32.mrf.mxu0 }
 0x11e   :  { %213 = vtanh.f32 %v132_v20 }
 0x12b   :  { %v214_v22 = vpop.eup %213 }
 0x12c   :  { %136 = vst [vmem:[#allocation7] sm:$0xff] %v214_v22 }
 0x12d   :  { %266 = shalt.err (!%p263_p0)
}
 0x12e   :  { %146 = dma.vmem_to_hbm [thread:$0]  %s144_s25, 128, %s323_s3, [#allocation4]  }
 0x12f   :  { %279 = dma.done.wait [#allocation4], 128  }
 0x130   :  { %280 = vsyncadd [#allocation4], 4294967168 }
 0x131   :  { %150 = vsyncpa [#allocation3], 1 }
 0x132   :  { %151 = vsyncpa [#allocation6], 1 }
 0x133   :  { %152 = vsyncpa [#allocation4], 1 }

</bundles_post_ra>
